<compile_context>
chip_gen: v6e
topology: v6e:2x2x1
jax: 0.10.0
libtpu: 0.0.40
codegen_flags: <defaults>
</compile_context>

<pallas_src>
import functools

import jax
import jax.numpy as jnp
from jax import lax
from jax.experimental import pallas as pl
from jax.experimental.pallas import tpu as pltpu

NUM_EMBED = 21
EMBED_DIM = 16
CHANNELS = [16, 32, 32, 16]
KERNEL_SIZES = [5, 3, 3]
BN_EPS = 1e-5


def convnet_kernel(idx_ref, embT_ref, w_ref, p_ref, out_ref, *, B, L):
    """Single-program kernel. idx_ref: (1, B*L) int32; embT_ref: (D, V);
    w_ref: packed (sum(Cout), max(k*Cin)) conv weights; p_ref: (max(Cout), 3*nlayers)
    with columns [bias, gamma, beta] per layer; out_ref: (Cf, B*Lout)."""
    D, V = embT_ref.shape

    # ---- embedding: one one-hot build + one MXU matmul for the whole batch ----
    idx = idx_ref[...]                                                    # (1, B*L)
    oh = (lax.broadcasted_iota(jnp.int32, (V, B * L), 0) == idx).astype(jnp.float32)
    x = jnp.dot(embT_ref[...], oh, preferred_element_type=jnp.float32)   # (D, B*L)

    Lin = L
    row_off = 0
    for li, (cin, cout, k) in enumerate(zip(CHANNELS[:-1], CHANNELS[1:], KERNEL_SIZES)):
        Lout = Lin - k + 1

        # ---- im2col: (k*Cin, B*Lout) from static slices; windows stay inside each batch ----
        cols = []
        for b in range(B):
            base = b * Lin
            cols.append(jnp.concatenate(
                [x[:, base + dk: base + dk + Lout] for dk in range(k)], axis=0))
        patches = jnp.concatenate(cols, axis=1)                           # (k*Cin, B*Lout)

        w = w_ref[row_off:row_off + cout, 0:k * cin]                      # (Cout, k*Cin)
        row_off += cout
        bias = p_ref[0:cout, 3 * li + 0:3 * li + 1]                       # (Cout, 1)
        gamma = p_ref[0:cout, 3 * li + 1:3 * li + 2]
        beta = p_ref[0:cout, 3 * li + 2:3 * li + 3]

        # ---- one MXU matmul per layer + bias ----
        y = jnp.dot(w, patches, preferred_element_type=jnp.float32) + bias  # (Cout, B*Lout)

        # ---- train-mode BN: one-pass stats, folded affine, ReLU ----
        n = float(B * Lout)
        mean = jnp.sum(y, axis=1, keepdims=True) / n
        ex2 = jnp.sum(y * y, axis=1, keepdims=True) / n
        var = jnp.maximum(ex2 - mean * mean, 0.0)                         # clamp: E[y^2]-m^2 >= 0
        scale = gamma * lax.rsqrt(var + BN_EPS)
        shift = beta - mean * scale
        x = jnp.maximum(y * scale + shift, 0.0)                           # (Cout, B*Lout)

        Lin = Lout

    out_ref[...] = x                                                      # single store (Cf, B*Lout)


def convnet_forward(idx, params):
    """Wrapper: parameter packing / layout glue (plain XLA) + single-program pallas_call."""
    B, L = idx.shape
    Lout = L - sum(k - 1 for k in KERNEL_SIZES)
    Cf = CHANNELS[-1]
    nl = len(KERNEL_SIZES)
    max_cout = max(CHANNELS[1:])
    max_kcin = max(k * c for k, c in zip(KERNEL_SIZES, CHANNELS[:-1]))
    tot_rows = sum(CHANNELS[1:])

    # Pack conv weights into one buffer (rows = concatenated Cout, cols = flattened (k, Cin)).
    # Pack all per-channel params (bias, gamma, beta per layer) into one (max_Cout, 3*nl) buffer.
    wpack = jnp.zeros((tot_rows, max_kcin), jnp.float32)
    ppack = jnp.zeros((max_cout, 3 * nl), jnp.float32)
    r0 = 0
    for i, (w, b, g, be) in enumerate(params["layers"]):
        cout, cin, k = w.shape
        wcat = jnp.transpose(w, (0, 2, 1)).reshape(cout, k * cin)   # rows match im2col dk-major order
        wpack = wpack.at[r0:r0 + cout, :k * cin].set(wcat)
        ppack = ppack.at[:cout, 3 * i + 0].set(b)
        ppack = ppack.at[:cout, 3 * i + 1].set(g)
        ppack = ppack.at[:cout, 3 * i + 2].set(be)
        r0 += cout

    idx_flat = idx.astype(jnp.int32).reshape(1, B * L)              # batch folded into lanes
    embT = params["embedding"].T                                    # (D, V)

    # Advisory cost estimate for XLA scheduling.
    flops = 2 * EMBED_DIM * (NUM_EMBED + 1) * B * L
    li_len = L
    for cin, cout, k in zip(CHANNELS[:-1], CHANNELS[1:], KERNEL_SIZES):
        lo = li_len - k + 1
        flops += 2 * cout * k * cin * B * lo
        li_len = lo
    bytes_accessed = 4 * (idx_flat.size + embT.size + wpack.size + ppack.size + Cf * B * Lout)

    out_flat = pl.pallas_call(
        functools.partial(convnet_kernel, B=B, L=L),
        out_shape=jax.ShapeDtypeStruct((Cf, B * Lout), jnp.float32),
        in_specs=[pl.BlockSpec(memory_space=pltpu.MemorySpace.VMEM)] * 4,
        out_specs=pl.BlockSpec(memory_space=pltpu.MemorySpace.VMEM),
        cost_estimate=pl.CostEstimate(flops=flops,
                                      transcendentals=sum(CHANNELS[1:]),
                                      bytes_accessed=bytes_accessed),
    )(idx_flat, embT, wpack, ppack)

    # Layout plumbing back to the module's NCL convention (outside the kernel).
    return out_flat.reshape(Cf, B, Lout).transpose(1, 0, 2)         # (B, Cf, Lout)


def init_params(key):
    """Deterministic synthetic parameters matching the module's shapes."""
    keys = jax.random.split(key, 16)
    emb = jax.random.normal(keys[0], (NUM_EMBED + 1, EMBED_DIM), jnp.float32)
    emb = emb.at[NUM_EMBED].set(0.0)                                # padding_idx row
    layers = []
    ki = 1
    for i, (cin, cout) in enumerate(zip(CHANNELS[:-1], CHANNELS[1:])):
        k = KERNEL_SIZES[i]
        scale = 1.0 / (cin * k) ** 0.5
        w = jax.random.uniform(keys[ki], (cout, cin, k), jnp.float32, -scale, scale); ki += 1
        b = jax.random.uniform(keys[ki], (cout,), jnp.float32, -scale, scale); ki += 1
        g = 1.0 + 0.1 * jax.random.normal(keys[ki], (cout,), jnp.float32); ki += 1
        be = 0.1 * jax.random.normal(keys[ki], (cout,), jnp.float32); ki += 1
        layers.append((w, b, g, be))
    return {"embedding": emb, "layers": layers}


def reference_forward(idx, params):
    """Pure-JAX/XLA reference mirroring the PyTorch module (train-mode BN)."""
    x = params["embedding"][idx]                                    # (B, L, D)
    x = jnp.transpose(x, (0, 2, 1))                                 # (B, D, L)  -> NCL
    for (w, b, g, be) in params["layers"]:
        x = lax.conv_general_dilated(x, w, window_strides=(1,), padding="VALID",
                                     dimension_numbers=("NCH", "OIH", "NCH"))
        x = x + b[None, :, None]
        mean = jnp.mean(x, axis=(0, 2), keepdims=True)
        var = jnp.mean((x - mean) ** 2, axis=(0, 2), keepdims=True)
        x = (x - mean) * lax.rsqrt(var + BN_EPS) * g[None, :, None] + be[None, :, None]
        x = jnp.maximum(x, 0.0)
    return x


if __name__ == "__main__":
    key = jax.random.PRNGKey(0)
    pkey, xkey = jax.random.split(key)

    params = init_params(pkey)

    batch, seq_len = 2, 16
    idx = jax.random.randint(xkey, (batch, seq_len), 0, NUM_EMBED + 1, dtype=jnp.int32)

    out = jax.block_until_ready(convnet_forward(idx, params))
    ref = jax.block_until_ready(reference_forward(idx, params))

    assert out.shape == (batch, CHANNELS[-1], seq_len - sum(k - 1 for k in KERNEL_SIZES))
    max_err = float(jnp.max(jnp.abs(out - ref)))
    assert max_err < 1e-3, f"mismatch vs reference, max abs err = {max_err}"

    print("KERNEL_OK")
</pallas_src>

<mosaic_0001>
module attributes {stable_mosaic.version = 11 : i64} {
  func.func @convnet_kernel(%arg0: memref<1x32xi32, #tpu.memory_space<vmem>>, %arg1: memref<16x22xf32, #tpu.memory_space<vmem>>, %arg2: memref<80x96xf32, #tpu.memory_space<vmem>>, %arg3: memref<32x9xf32, #tpu.memory_space<vmem>>, %arg4: memref<16x16xf32, #tpu.memory_space<vmem>>) attributes {dimension_semantics = [], scalar_prefetch = 0 : i64, scratch_operands = 0 : i64, tpu.core_type = #tpu.core_type<tc>} {
    %c0 = arith.constant 0 : index
    %c0_0 = arith.constant 0 : index
    %0 = vector.load %arg0[%c0, %c0_0] : memref<1x32xi32, #tpu.memory_space<vmem>>, vector<1x32xi32>
    %1 = tpu.iota {dimensions = array<i32: 0>} : vector<22x32xi32>
    %2 = vector.broadcast %0 : vector<1x32xi32> to vector<22x32xi32>
    %3 = arith.cmpi eq, %1, %2 : vector<22x32xi32>
    %4 = arith.extui %3 : vector<22x32xi1> to vector<22x32xi32>
    %5 = arith.sitofp %4 : vector<22x32xi32> to vector<22x32xf32>
    %c0_1 = arith.constant 0 : index
    %c0_2 = arith.constant 0 : index
    %6 = vector.load %arg1[%c0_1, %c0_2] : memref<16x22xf32, #tpu.memory_space<vmem>>, vector<16x22xf32>
    %cst = arith.constant dense<0.000000e+00> : vector<16x32xf32>
    %7 = tpu.matmul %6, %5, %cst {dimension_numbers = #tpu.dot_dimension_numbers<[1], [0], [0], [1], [0, 0, 1, 1], [], []>} : vector<16x22xf32>, vector<22x32xf32>, vector<16x32xf32> -> vector<16x32xf32>
    %8 = vector.extract_strided_slice %7 {offsets = [0, 0], sizes = [16, 12], strides = [1, 1]} : vector<16x32xf32> to vector<16x12xf32>
    %9 = vector.extract_strided_slice %7 {offsets = [0, 1], sizes = [16, 12], strides = [1, 1]} : vector<16x32xf32> to vector<16x12xf32>
    %10 = vector.extract_strided_slice %7 {offsets = [0, 2], sizes = [16, 12], strides = [1, 1]} : vector<16x32xf32> to vector<16x12xf32>
    %11 = vector.extract_strided_slice %7 {offsets = [0, 3], sizes = [16, 12], strides = [1, 1]} : vector<16x32xf32> to vector<16x12xf32>
    %12 = vector.extract_strided_slice %7 {offsets = [0, 4], sizes = [16, 12], strides = [1, 1]} : vector<16x32xf32> to vector<16x12xf32>
    %13 = tpu.concatenate %8, %9, %10, %11, %12 in 0 : vector<16x12xf32>, vector<16x12xf32>, vector<16x12xf32>, vector<16x12xf32>, vector<16x12xf32> -> vector<80x12xf32>
    %14 = vector.extract_strided_slice %7 {offsets = [0, 16], sizes = [16, 12], strides = [1, 1]} : vector<16x32xf32> to vector<16x12xf32>
    %15 = vector.extract_strided_slice %7 {offsets = [0, 17], sizes = [16, 12], strides = [1, 1]} : vector<16x32xf32> to vector<16x12xf32>
    %16 = vector.extract_strided_slice %7 {offsets = [0, 18], sizes = [16, 12], strides = [1, 1]} : vector<16x32xf32> to vector<16x12xf32>
    %17 = vector.extract_strided_slice %7 {offsets = [0, 19], sizes = [16, 12], strides = [1, 1]} : vector<16x32xf32> to vector<16x12xf32>
    %18 = vector.extract_strided_slice %7 {offsets = [0, 20], sizes = [16, 12], strides = [1, 1]} : vector<16x32xf32> to vector<16x12xf32>
    %19 = tpu.concatenate %14, %15, %16, %17, %18 in 0 : vector<16x12xf32>, vector<16x12xf32>, vector<16x12xf32>, vector<16x12xf32>, vector<16x12xf32> -> vector<80x12xf32>
    %20 = tpu.concatenate %13, %19 in 1 : vector<80x12xf32>, vector<80x12xf32> -> vector<80x24xf32>
    %c0_3 = arith.constant 0 : index
    %c0_4 = arith.constant 0 : index
    %21 = vector.load %arg2[%c0_3, %c0_4] : memref<80x96xf32, #tpu.memory_space<vmem>>, vector<32x80xf32>
    %c0_5 = arith.constant 0 : index
    %c0_6 = arith.constant 0 : index
    %22 = vector.load %arg3[%c0_5, %c0_6] : memref<32x9xf32, #tpu.memory_space<vmem>>, vector<32x1xf32>
    %c0_7 = arith.constant 0 : index
    %c1 = arith.constant 1 : index
    %23 = vector.load %arg3[%c0_7, %c1] : memref<32x9xf32, #tpu.memory_space<vmem>>, vector<32x1xf32>
    %c0_8 = arith.constant 0 : index
    %c2 = arith.constant 2 : index
    %24 = vector.load %arg3[%c0_8, %c2] : memref<32x9xf32, #tpu.memory_space<vmem>>, vector<32x1xf32>
    %cst_9 = arith.constant dense<0.000000e+00> : vector<32x24xf32>
    %25 = tpu.matmul %21, %20, %cst_9 {dimension_numbers = #tpu.dot_dimension_numbers<[1], [0], [0], [1], [0, 0, 1, 1], [], []>} : vector<32x80xf32>, vector<80x24xf32>, vector<32x24xf32> -> vector<32x24xf32>
    %26 = vector.broadcast %22 : vector<32x1xf32> to vector<32x24xf32>
    %27 = arith.addf %25, %26 : vector<32x24xf32>
    %cst_10 = arith.constant dense<0.000000e+00> : vector<32xf32>
    %28 = vector.multi_reduction <add>, %27, %cst_10 [1] : vector<32x24xf32> to vector<32xf32>
    %29 = vector.shape_cast %28 : vector<32xf32> to vector<32x1xf32>
    %cst_11 = arith.constant 2.400000e+01 : f32
    %30 = vector.broadcast %cst_11 : f32 to vector<32x1xf32>
    %31 = arith.divf %29, %30 : vector<32x1xf32>
    %32 = arith.mulf %27, %27 : vector<32x24xf32>
    %cst_12 = arith.constant dense<0.000000e+00> : vector<32xf32>
    %33 = vector.multi_reduction <add>, %32, %cst_12 [1] : vector<32x24xf32> to vector<32xf32>
    %34 = vector.shape_cast %33 : vector<32xf32> to vector<32x1xf32>
    %cst_13 = arith.constant 2.400000e+01 : f32
    %35 = vector.broadcast %cst_13 : f32 to vector<32x1xf32>
    %36 = arith.divf %34, %35 : vector<32x1xf32>
    %37 = arith.mulf %31, %31 : vector<32x1xf32>
    %38 = arith.subf %36, %37 : vector<32x1xf32>
    %cst_14 = arith.constant 0.000000e+00 : f32
    %39 = vector.broadcast %cst_14 : f32 to vector<32x1xf32>
    %40 = arith.maximumf %38, %39 : vector<32x1xf32>
    %cst_15 = arith.constant 9.99999974E-6 : f32
    %41 = vector.broadcast %cst_15 : f32 to vector<32x1xf32>
    %42 = arith.addf %40, %41 : vector<32x1xf32>
    %43 = math.rsqrt %42 : vector<32x1xf32>
    %44 = arith.mulf %23, %43 : vector<32x1xf32>
    %45 = arith.mulf %31, %44 : vector<32x1xf32>
    %46 = arith.subf %24, %45 : vector<32x1xf32>
    %47 = vector.broadcast %44 : vector<32x1xf32> to vector<32x24xf32>
    %48 = arith.mulf %27, %47 : vector<32x24xf32>
    %49 = vector.broadcast %46 : vector<32x1xf32> to vector<32x24xf32>
    %50 = arith.addf %48, %49 : vector<32x24xf32>
    %cst_16 = arith.constant 0.000000e+00 : f32
    %51 = vector.broadcast %cst_16 : f32 to vector<32x24xf32>
    %52 = arith.maximumf %50, %51 : vector<32x24xf32>
    %53 = vector.extract_strided_slice %52 {offsets = [0, 0], sizes = [32, 10], strides = [1, 1]} : vector<32x24xf32> to vector<32x10xf32>
    %54 = vector.extract_strided_slice %52 {offsets = [0, 1], sizes = [32, 10], strides = [1, 1]} : vector<32x24xf32> to vector<32x10xf32>
    %55 = vector.extract_strided_slice %52 {offsets = [0, 2], sizes = [32, 10], strides = [1, 1]} : vector<32x24xf32> to vector<32x10xf32>
    %56 = tpu.concatenate %53, %54, %55 in 0 : vector<32x10xf32>, vector<32x10xf32>, vector<32x10xf32> -> vector<96x10xf32>
    %57 = vector.extract_strided_slice %52 {offsets = [0, 12], sizes = [32, 10], strides = [1, 1]} : vector<32x24xf32> to vector<32x10xf32>
    %58 = vector.extract_strided_slice %52 {offsets = [0, 13], sizes = [32, 10], strides = [1, 1]} : vector<32x24xf32> to vector<32x10xf32>
    %59 = vector.extract_strided_slice %52 {offsets = [0, 14], sizes = [32, 10], strides = [1, 1]} : vector<32x24xf32> to vector<32x10xf32>
    %60 = tpu.concatenate %57, %58, %59 in 0 : vector<32x10xf32>, vector<32x10xf32>, vector<32x10xf32> -> vector<96x10xf32>
    %61 = tpu.concatenate %56, %60 in 1 : vector<96x10xf32>, vector<96x10xf32> -> vector<96x20xf32>
    %c32 = arith.constant 32 : index
    %c0_17 = arith.constant 0 : index
    %62 = vector.load %arg2[%c32, %c0_17] : memref<80x96xf32, #tpu.memory_space<vmem>>, vector<32x96xf32>
    %c0_18 = arith.constant 0 : index
    %c3 = arith.constant 3 : index
    %63 = vector.load %arg3[%c0_18, %c3] : memref<32x9xf32, #tpu.memory_space<vmem>>, vector<32x1xf32>
    %c0_19 = arith.constant 0 : index
    %c4 = arith.constant 4 : index
    %64 = vector.load %arg3[%c0_19, %c4] : memref<32x9xf32, #tpu.memory_space<vmem>>, vector<32x1xf32>
    %c0_20 = arith.constant 0 : index
    %c5 = arith.constant 5 : index
    %65 = vector.load %arg3[%c0_20, %c5] : memref<32x9xf32, #tpu.memory_space<vmem>>, vector<32x1xf32>
    %cst_21 = arith.constant dense<0.000000e+00> : vector<32x20xf32>
    %66 = tpu.matmul %62, %61, %cst_21 {dimension_numbers = #tpu.dot_dimension_numbers<[1], [0], [0], [1], [0, 0, 1, 1], [], []>} : vector<32x96xf32>, vector<96x20xf32>, vector<32x20xf32> -> vector<32x20xf32>
    %67 = vector.broadcast %63 : vector<32x1xf32> to vector<32x20xf32>
    %68 = arith.addf %66, %67 : vector<32x20xf32>
    %cst_22 = arith.constant dense<0.000000e+00> : vector<32xf32>
    %69 = vector.multi_reduction <add>, %68, %cst_22 [1] : vector<32x20xf32> to vector<32xf32>
    %70 = vector.shape_cast %69 : vector<32xf32> to vector<32x1xf32>
    %cst_23 = arith.constant 2.000000e+01 : f32
    %71 = vector.broadcast %cst_23 : f32 to vector<32x1xf32>
    %72 = arith.divf %70, %71 : vector<32x1xf32>
    %73 = arith.mulf %68, %68 : vector<32x20xf32>
    %cst_24 = arith.constant dense<0.000000e+00> : vector<32xf32>
    %74 = vector.multi_reduction <add>, %73, %cst_24 [1] : vector<32x20xf32> to vector<32xf32>
    %75 = vector.shape_cast %74 : vector<32xf32> to vector<32x1xf32>
    %cst_25 = arith.constant 2.000000e+01 : f32
    %76 = vector.broadcast %cst_25 : f32 to vector<32x1xf32>
    %77 = arith.divf %75, %76 : vector<32x1xf32>
    %78 = arith.mulf %72, %72 : vector<32x1xf32>
    %79 = arith.subf %77, %78 : vector<32x1xf32>
    %cst_26 = arith.constant 0.000000e+00 : f32
    %80 = vector.broadcast %cst_26 : f32 to vector<32x1xf32>
    %81 = arith.maximumf %79, %80 : vector<32x1xf32>
    %cst_27 = arith.constant 9.99999974E-6 : f32
    %82 = vector.broadcast %cst_27 : f32 to vector<32x1xf32>
    %83 = arith.addf %81, %82 : vector<32x1xf32>
    %84 = math.rsqrt %83 : vector<32x1xf32>
    %85 = arith.mulf %64, %84 : vector<32x1xf32>
    %86 = arith.mulf %72, %85 : vector<32x1xf32>
    %87 = arith.subf %65, %86 : vector<32x1xf32>
    %88 = vector.broadcast %85 : vector<32x1xf32> to vector<32x20xf32>
    %89 = arith.mulf %68, %88 : vector<32x20xf32>
    %90 = vector.broadcast %87 : vector<32x1xf32> to vector<32x20xf32>
    %91 = arith.addf %89, %90 : vector<32x20xf32>
    %cst_28 = arith.constant 0.000000e+00 : f32
    %92 = vector.broadcast %cst_28 : f32 to vector<32x20xf32>
    %93 = arith.maximumf %91, %92 : vector<32x20xf32>
    %94 = vector.extract_strided_slice %93 {offsets = [0, 0], sizes = [32, 8], strides = [1, 1]} : vector<32x20xf32> to vector<32x8xf32>
    %95 = vector.extract_strided_slice %93 {offsets = [0, 1], sizes = [32, 8], strides = [1, 1]} : vector<32x20xf32> to vector<32x8xf32>
    %96 = vector.extract_strided_slice %93 {offsets = [0, 2], sizes = [32, 8], strides = [1, 1]} : vector<32x20xf32> to vector<32x8xf32>
    %97 = tpu.concatenate %94, %95, %96 in 0 : vector<32x8xf32>, vector<32x8xf32>, vector<32x8xf32> -> vector<96x8xf32>
    %98 = vector.extract_strided_slice %93 {offsets = [0, 10], sizes = [32, 8], strides = [1, 1]} : vector<32x20xf32> to vector<32x8xf32>
    %99 = vector.extract_strided_slice %93 {offsets = [0, 11], sizes = [32, 8], strides = [1, 1]} : vector<32x20xf32> to vector<32x8xf32>
    %100 = vector.extract_strided_slice %93 {offsets = [0, 12], sizes = [32, 8], strides = [1, 1]} : vector<32x20xf32> to vector<32x8xf32>
    %101 = tpu.concatenate %98, %99, %100 in 0 : vector<32x8xf32>, vector<32x8xf32>, vector<32x8xf32> -> vector<96x8xf32>
    %102 = tpu.concatenate %97, %101 in 1 : vector<96x8xf32>, vector<96x8xf32> -> vector<96x16xf32>
    %c64 = arith.constant 64 : index
    %c0_29 = arith.constant 0 : index
    %103 = vector.load %arg2[%c64, %c0_29] : memref<80x96xf32, #tpu.memory_space<vmem>>, vector<16x96xf32>
    %c0_30 = arith.constant 0 : index
    %c6 = arith.constant 6 : index
    %104 = vector.load %arg3[%c0_30, %c6] : memref<32x9xf32, #tpu.memory_space<vmem>>, vector<16x1xf32>
    %c0_31 = arith.constant 0 : index
    %c7 = arith.constant 7 : index
    %105 = vector.load %arg3[%c0_31, %c7] : memref<32x9xf32, #tpu.memory_space<vmem>>, vector<16x1xf32>
    %c0_32 = arith.constant 0 : index
    %c8 = arith.constant 8 : index
    %106 = vector.load %arg3[%c0_32, %c8] : memref<32x9xf32, #tpu.memory_space<vmem>>, vector<16x1xf32>
    %cst_33 = arith.constant dense<0.000000e+00> : vector<16x16xf32>
    %107 = tpu.matmul %103, %102, %cst_33 {dimension_numbers = #tpu.dot_dimension_numbers<[1], [0], [0], [1], [0, 0, 1, 1], [], []>} : vector<16x96xf32>, vector<96x16xf32>, vector<16x16xf32> -> vector<16x16xf32>
    %108 = vector.broadcast %104 : vector<16x1xf32> to vector<16x16xf32>
    %109 = arith.addf %107, %108 : vector<16x16xf32>
    %cst_34 = arith.constant dense<0.000000e+00> : vector<16xf32>
    %110 = vector.multi_reduction <add>, %109, %cst_34 [1] : vector<16x16xf32> to vector<16xf32>
    %111 = vector.shape_cast %110 : vector<16xf32> to vector<16x1xf32>
    %cst_35 = arith.constant 1.600000e+01 : f32
    %112 = vector.broadcast %cst_35 : f32 to vector<16x1xf32>
    %113 = arith.divf %111, %112 : vector<16x1xf32>
    %114 = arith.mulf %109, %109 : vector<16x16xf32>
    %cst_36 = arith.constant dense<0.000000e+00> : vector<16xf32>
    %115 = vector.multi_reduction <add>, %114, %cst_36 [1] : vector<16x16xf32> to vector<16xf32>
    %116 = vector.shape_cast %115 : vector<16xf32> to vector<16x1xf32>
    %cst_37 = arith.constant 1.600000e+01 : f32
    %117 = vector.broadcast %cst_37 : f32 to vector<16x1xf32>
    %118 = arith.divf %116, %117 : vector<16x1xf32>
    %119 = arith.mulf %113, %113 : vector<16x1xf32>
    %120 = arith.subf %118, %119 : vector<16x1xf32>
    %cst_38 = arith.constant 0.000000e+00 : f32
    %121 = vector.broadcast %cst_38 : f32 to vector<16x1xf32>
    %122 = arith.maximumf %120, %121 : vector<16x1xf32>
    %cst_39 = arith.constant 9.99999974E-6 : f32
    %123 = vector.broadcast %cst_39 : f32 to vector<16x1xf32>
    %124 = arith.addf %122, %123 : vector<16x1xf32>
    %125 = math.rsqrt %124 : vector<16x1xf32>
    %126 = arith.mulf %105, %125 : vector<16x1xf32>
    %127 = arith.mulf %113, %126 : vector<16x1xf32>
    %128 = arith.subf %106, %127 : vector<16x1xf32>
    %129 = vector.broadcast %126 : vector<16x1xf32> to vector<16x16xf32>
    %130 = arith.mulf %109, %129 : vector<16x16xf32>
    %131 = vector.broadcast %128 : vector<16x1xf32> to vector<16x16xf32>
    %132 = arith.addf %130, %131 : vector<16x16xf32>
    %cst_40 = arith.constant 0.000000e+00 : f32
    %133 = vector.broadcast %cst_40 : f32 to vector<16x16xf32>
    %134 = arith.maximumf %132, %133 : vector<16x16xf32>
    %c0_41 = arith.constant 0 : index
    %c0_42 = arith.constant 0 : index
    %135 = vector.load %arg4[%c0_41, %c0_42] : memref<16x16xf32, #tpu.memory_space<vmem>>, vector<16x16xf32>
    tpu.vector_store %arg4[%c0_41, %c0_42], %134 {strides = array<i32>} : memref<16x16xf32, #tpu.memory_space<vmem>>, vector<16x16xf32>,
    return
  }
}

</mosaic_0001>

<bundles_post_ra>
// kernel: tpu_custom_call.1
= control target key start
LH: loop header
LB: loop body
LE: loop exit
PB: predicated region body
PF: predicated region fallthrough
CT: control target
= control target key end

     0   :  { %9 = vsyncpa [#allocation3], 0  ;;  %s1658_s0 = inlined_call_operand.vmem [shape: s32[1,32], index: 0, kind: input, shape index: {}]   ;;  %s1659_s1 = inlined_call_operand.vmem [shape: f32[16,22], index: 1, kind: input, shape index: {}]   ;;  %s1660_s2 = inlined_call_operand.hbm [shape: f32[80,96], index: 2, kind: input, shape index: {}]   ;;  %s1661_s3 = inlined_call_operand.vmem [shape: f32[32,9], index: 3, kind: input, shape index: {}]   ;;  %s1662_s4 = inlined_call_operand.hbm [shape: f32[16,16], index: 4, kind: output, shape index: {}]  }
   0x1   :  { %10 = vsyncpa [#allocation4], 0  ;;  %s1297_s15 = smov [#allocation2]  }
   0x2   :  { %s20_s16 = sshll.u32 %s1297_s15, 4  ;;  %s21_s16 = int_to_ptr.vmem [resolvable:$true] %s20_s16 }
   0x3   :  { %s1261_s17 = scalar_lea.vmem %s21_s16, 1280  ;;  %p1266_p1 = scmp.lt.s32.totalorder %s21_s16, %s21_s16 }
   0x4   :  { %p1262_p0 = scmp.ne.s32.totalorder %s21_s16, %s1261_s17  ;;  %p1267_p2 = scmp.lt.s32.totalorder %s1261_s17, %s1261_s17 }
   0x6   :  { %p1268_p3 = por %p1267_p2, %p1266_p1 }
   0x8   :  { %p1269_p4 = pnand %p1268_p3, %p1262_p0 }
   0xa   :  { %1272 = shalt.err (!%p1269_p4)
}
   0xb   :  { %s1298_s18 = smov 128   ;;  %s1299_s19 = smov 8  }
   0xc   :  { %26 = dma.hbm_to_vmem [thread:$0]  %s1660_s2, 1280, %s21_s16, [#allocation3], %s1298_s18, %s1298_s18, %s1299_s19  }
   0xd   :  { %1293 = dma.done.wait [#allocation3], 1280  }
   0xe   :  { %1294 = vsyncadd [#allocation3], 4294966016  ;;  %v33_v0 = vlaneseq  ;;  %vm52_vm0 = vcmask 179200   ;;  %v1033_v4 = vld [vmem:[%s1658_s0] ss:$0 sm:$0xff]  ;;  %vm59_vm1 = vcmask 1045504  }
   0xf   :  { %v50_v5 = vld [vmem:[%s1659_s1] sm:$0xff]  ;;  %v1300_v6 = vmov 0.0   ;;  %v1301_v8 = vmov 1.0   ;;  %v51_v9 = vld [vmem:[%s1659_s1 + $0x8] sm:$0xff]  ;;  %s1302_s0 = smov 125   ;;  %s1303_s27 = smov 124  }
  0x10   :  { %v34_v1 = vshrl.u32 %v33_v0, 7  ;;  %1107 = vmatprep.mubr.msk.f32.mxu0 %vm52_vm0, %v50_v5  ;;  %s1304_s1 = smov 126   ;;  %s1305_s28 = smov 127   ;;  %v199_v17 = vld [vmem:[#allocation2] sm:$0xff]  ;;  %vm227_vm5 = vcmask 654336   ;;  %v1394_v20 = vld [vmem:[%s1661_s3 + $0x18] sm:$0xff] }
  0x11   :  { %1130 = vmatprep.mubr.msk.f32.mxu1 %vm227_vm5, %v199_v17  ;;  %v1306_v22 = vmov 0   ;;  %v1401_v23 = vld [vmem:[%s1661_s3 + $0x10] sm:$0xff]  ;;  %v1406_v24 = vld [vmem:[%s1661_s3] sm:$0xff]  ;;  %v1413_v25 = vld [vmem:[%s1661_s3 + $0x8] sm:$0xff]  ;;  %vm188_vm6 = vcmask 97280   ;;  %vm325_vm7 = vcmask 195584  }
  0x12   :  { %v36_v2 = vadd.s32 16, %v34_v1  ;;  %v35_v3 = vadd.s32 8, %v34_v1  ;;  %vm41_vm4 = vcmp.eq.s32.totalorder %v34_v1, %v1033_v4  ;;  %1214 = vset.pattern.permute.xlu1 %v1306_v22  ;;  %1213 = vset.pattern.permute.xlu0 %v1306_v22  ;;  %v200_v44 = vld [vmem:[#allocation2 + $0x8] sm:$0xff]  ;;  %v201_v45 = vld [vmem:[#allocation2 + $0x10] sm:$0xff]  ;;  %v202_v46 = vld [vmem:[#allocation2 + $0x18] sm:$0xff]  ;;  %s1308_s11 = smov 1  }
  0x13   :  { %vm548_vm8 = vcmask 785408   ;;  %vm515_vm9 = vcmask 80896   ;;  %vm646_vm10 = vcmask 162816   ;;  %vm836_vm11 = vcmask 64512   ;;  %s1316_s16 = smov [#allocation5]  }
  0x14   :  { %vm43_vm2 = vcmp.eq.s32.totalorder %v36_v2, %v1033_v4  ;;  %vm42_vm3 = vcmp.eq.s32.totalorder %v35_v3, %v1033_v4  ;;  %vm944_vm12 = vcmask 130048   ;;  %s1021_s17 = sshll.u32 %s1316_s16, 4  ;;  %s1022_s17 = int_to_ptr.vmem [resolvable:$true] %s1021_s17 }
  0x15   :  { %v1036_v7 = vsel %vm43_vm2, 1.0, %v1300_v6  ;;  %p1278_p6 = scmp.lt.s32.totalorder %s1022_s17, %s1022_s17 }
  0x16   :  { %1101 = vmatprep.subr.msk.mxu0 %vm59_vm1, %v1036_v7 }
  0x17   :  { %1102 = vmatpush3.msk.msra.mxu0 %vm59_vm1, %v1036_v7  ;;  %v1307_v7 = vmov 1  }
  0x18   :  { %1103 = vmatprep.subr.msk.mxu0 %vm42_vm3, %v1301_v8 }
  0x19   :  { %1104 = vmatpush3.msk.msra.mxu0 %vm42_vm3, %v1301_v8 }
  0x1a   :  { %1105 = vmatprep.subr.msk.mxu0 %vm41_vm4, %v1301_v8 }
  0x1b   :  { %1106 = vmatpush3.msk.msra.mxu0 %vm41_vm4, %v1301_v8 }
  0x1c   :  { %1108 = vmatmul.mubr.msk.f32.vlgmr.msra.gmra.mxu0 %vm52_vm0, %v51_v9 }
  0xdc   :  { %v1359_v10 = vpop.f32.mrf.mxu0 }
  0xdd   :  { %154 = vrot.lane.b32.xlu1 %v1359_v10, %s1302_s0  ;;  %160 = vrot.lane.b32.xlu0 %v1359_v10, %s1303_s27 }
  0xde   :  { %v1364_v11 = vpop.f32.mrf.mxu0 }
  0xe1   :  { %152 = vrot.lane.b32.xlu1 %v1364_v11, %s1302_s0  ;;  %158 = vrot.lane.b32.xlu0 %v1364_v11, %s1303_s27 }
  0xe5   :  { %146 = vrot.lane.b32.xlu1 %v1364_v11, %s1304_s1  ;;  %148 = vrot.lane.b32.xlu0 %v1359_v10, %s1304_s1 }
  0xe9   :  { %140 = vrot.lane.b32.xlu1 %v1364_v11, %s1305_s28  ;;  %142 = vrot.lane.b32.xlu0 %v1359_v10, %s1305_s28 }
 0x14f   :  { %v155_v12 = vpop.permute.xlu1 %154  ;;  %v1377_v13 = vpop.permute.xlu0 %160 }
 0x150   :  { %178 = vrot.lane.b32.xlu0 %v1377_v13, %s1303_s27  ;;  %v190_v42 = vsel %vm188_vm6, %v1359_v10, %v1377_v13 }
 0x153   :  { %v153_v14 = vpop.permute.xlu1 %152  ;;  %v1381_v15 = vpop.permute.xlu0 %158 }
 0x154   :  { %174 = vrot.lane.b32.xlu0 %v155_v12, %s1303_s27  ;;  %176 = vrot.lane.b32.xlu1 %v1381_v15, %s1303_s27  ;;  %v189_v43 = vsel %vm188_vm6, %v1364_v11, %v1381_v15 }
 0x157   :  { %v149_v16 = vpop.permute.xlu0 %148  ;;  %v147_v18 = vpop.permute.xlu1 %146 }
 0x158   :  { %172 = vrot.lane.b32.xlu1 %v153_v14, %s1303_s27  ;;  %170 = vrot.lane.b32.xlu0 %v149_v16, %s1303_s27 }
 0x15b   :  { %v143_v19 = vpop.permute.xlu0 %142  ;;  %v141_v21 = vpop.permute.xlu1 %140 }
 0x15c   :  { %168 = vrot.lane.b32.xlu1 %v147_v18, %s1303_s27  ;;  %166 = vrot.lane.b32.xlu0 %v143_v19, %s1303_s27 }
 0x160   :  { %164 = vrot.lane.b32.xlu1 %v141_v21, %s1303_s27  ;;  %224 = vperm.xlu0 %1213, %v1394_v20  }
 0x164   :  { %219 = vperm.xlu1 %1214, %v1401_v23   ;;  %209 = vperm.xlu0 %1213, %v1406_v24  }
 0x168   :  { %214 = vperm.xlu1 %1214, %v1413_v25   ;;  %1216 = vset.pattern.permute.xlu0 %v1307_v7 }
 0x16c   :  { %1215 = vset.pattern.permute.xlu1 %v1307_v7 }
 0x1c2   :  { %v179_v26 = vpop.permute.xlu0 %178 }
 0x1c3   :  { %v198_v27 = vsel %vm188_vm6, %v1377_v13, %v179_v26 }
 0x1c4   :  { %1110 = vmatprep.subr.mxu1 %v198_v27 }
 0x1c5   :  { %1111 = vmatpush3.msra.mxu1 %v198_v27 }
 0x1c6   :  { %v177_v28 = vpop.permute.xlu1 %176  ;;  %v175_v29 = vpop.permute.xlu0 %174 }
 0x1c7   :  { %v197_v30 = vsel %vm188_vm6, %v1381_v15, %v177_v28  ;;  %v196_v31 = vsel %vm188_vm6, %v155_v12, %v175_v29 }
 0x1c8   :  { %1112 = vmatprep.subr.mxu1 %v197_v30 }
 0x1c9   :  { %1113 = vmatpush3.msra.mxu1 %v197_v30 }
 0x1ca   :  { %v173_v32 = vpop.permute.xlu1 %172  ;;  %1114 = vmatprep.subr.mxu1 %v196_v31  ;;  %v171_v33 = vpop.permute.xlu0 %170 }
 0x1cb   :  { %1115 = vmatpush3.msra.mxu1 %v196_v31  ;;  %v195_v34 = vsel %vm188_vm6, %v153_v14, %v173_v32  ;;  %v194_v35 = vsel %vm188_vm6, %v149_v16, %v171_v33 }
 0x1cc   :  { %1116 = vmatprep.subr.mxu1 %v195_v34 }
 0x1cd   :  { %1117 = vmatpush3.msra.mxu1 %v195_v34 }
 0x1ce   :  { %v169_v36 = vpop.permute.xlu1 %168  ;;  %1118 = vmatprep.subr.mxu1 %v194_v35  ;;  %v167_v37 = vpop.permute.xlu0 %166 }
 0x1cf   :  { %1119 = vmatpush3.msra.mxu1 %v194_v35  ;;  %v193_v38 = vsel %vm188_vm6, %v147_v18, %v169_v36  ;;  %v192_v39 = vsel %vm188_vm6, %v143_v19, %v167_v37 }
 0x1d0   :  { %1120 = vmatprep.subr.mxu1 %v193_v38 }
 0x1d1   :  { %1121 = vmatpush3.msra.mxu1 %v193_v38 }
 0x1d2   :  { %v165_v40 = vpop.permute.xlu1 %164  ;;  %1122 = vmatprep.subr.mxu1 %v192_v39 }
 0x1d3   :  { %1123 = vmatpush3.msra.mxu1 %v192_v39  ;;  %v191_v41 = vsel %vm188_vm6, %v141_v21, %v165_v40 }
 0x1d4   :  { %1124 = vmatprep.subr.mxu1 %v191_v41 }
 0x1d5   :  { %1125 = vmatpush3.msra.mxu1 %v191_v41 }
 0x1d6   :  { %1126 = vmatprep.subr.mxu1 %v190_v42 }
 0x1d7   :  { %1127 = vmatpush3.msra.mxu1 %v190_v42 }
 0x1d8   :  { %1128 = vmatprep.subr.mxu1 %v189_v43 }
 0x1d9   :  { %1129 = vmatpush3.msra.mxu1 %v189_v43 }
 0x1da   :  { %1131 = vmatmul.mubr.msk.f32.vlgmr.msra.gmra.mxu1 %vm227_vm5, %v200_v44 }
 0x1db   :  { %1133 = vmatprep.mubr.msk.f32.mxu1 %vm227_vm5, %v201_v45  ;;  %v225_v48 = vpop.permute.xlu0 %224 }
 0x1de   :  { %1134 = vmatmul.mubr.msk.f32.gmra.mxu1 %vm227_vm5, %v202_v46 }
 0x1df   :  { %v220_v47 = vpop.permute.xlu1 %219  ;;  %v210_v54 = vpop.permute.xlu0 %209 }
 0x1e3   :  { %v215_v49 = vpop.permute.xlu1 %214 }
 0x29a   :  { %v1132_v50 = vpop.f32.mrf.mxu1 }
 0x29b   :  { %v1435_v51 = vadd.f32 %v1132_v50, %v215_v49 }
 0x29c   :  { %v306_v52 = vpop.f32.mrf.mxu1 }
 0x29d   :  { %v329_v53 = vsel %vm325_vm7, %v1435_v51, 0.0  ;;  %v1441_v58 = vadd.f32 %v306_v52, %v210_v54  ;;  %v344_v5 = vmul.f32 %v1435_v51, %v1435_v51 }
 0x29e   :  { %330 = vadd.xlane.f32.xlu1 %v329_v53  ;;  %v1135_v55 = vpop.f32.mrf.mxu1 }
 0x29f   :  { %v1439_v56 = vadd.f32 %v1135_v55, %v225_v48  ;;  %v326_v63 = vsel %vm325_vm7, %v1441_v58, 0.0  ;;  %v343_v0 = vmul.f32 %v1441_v58, %v1441_v58  ;;  %v350_v6 = vsel %vm325_vm7, %v344_v5, 0.0 }
 0x2a0   :  { %v316_v57 = vpop.f32.mrf.mxu1 }
 0x2a1   :  { %v1443_v59 = vadd.f32 %v316_v57, %v220_v47  ;;  %v335_v60 = vsel %vm325_vm7, %v1439_v56, 0.0  ;;  %v346_v62 = vmul.f32 %v1439_v56, %v1439_v56  ;;  %v347_v3 = vsel %vm325_vm7, %v343_v0, 0.0 }
 0x2a2   :  { %336 = vadd.xlane.f32.xlu1 %v335_v60  ;;  %v1309_v60 = vmov 2  }
 0x2a3   :  { %v332_v61 = vsel %vm325_vm7, %v1443_v59, 0.0  ;;  %v356_v1 = vsel %vm325_vm7, %v346_v62, 0.0  ;;  %v345_v2 = vmul.f32 %v1443_v59, %v1443_v59 }
 0x2a4   :  { %333 = vadd.xlane.f32.xlu0 %v332_v61 }
 0x2a5   :  { %v353_v4 = vsel %vm325_vm7, %v345_v2, 0.0 }
 0x2a6   :  { %327 = vadd.xlane.f32.xlu1 %v326_v63 }
 0x2a8   :  { %357 = vadd.xlane.f32.xlu0 %v356_v1 }
 0x2aa   :  { %348 = vadd.xlane.f32.xlu1 %v347_v3 }
 0x2ac   :  { %354 = vadd.xlane.f32.xlu0 %v353_v4 }
 0x2b0   :  { %351 = vadd.xlane.f32.xlu0 %v350_v6 }
 0x327   :  { %v331_v8 = vpop.xlane.xlu1 %330 }
 0x328   :  { %v340_v26 = vmul.f32 0.041666668, %v331_v8 }
 0x32a   :  { %v364_v35 = vmul.f32 %v340_v26, %v340_v26 }
 0x32b   :  { %v337_v9 = vpop.xlane.xlu1 %336 }
 0x32c   :  { %v342_v11 = vmul.f32 0.041666668, %v337_v9 }
 0x32d   :  { %v334_v10 = vpop.xlane.xlu0 %333 }
 0x32e   :  { %v366_v15 = vmul.f32 %v342_v11, %v342_v11  ;;  %v341_v16 = vmul.f32 0.041666668, %v334_v10 }
 0x32f   :  { %v328_v12 = vpop.xlane.xlu1 %327 }
 0x330   :  { %v339_v13 = vmul.f32 0.041666668, %v328_v12  ;;  %v365_v28 = vmul.f32 %v341_v16, %v341_v16 }
 0x331   :  { %v358_v14 = vpop.xlane.xlu0 %357 }
 0x332   :  { %v362_v17 = vmul.f32 0.041666668, %v358_v14  ;;  %v363_v19 = vmul.f32 %v339_v13, %v339_v13 }
 0x333   :  { %v349_v18 = vpop.xlane.xlu1 %348 }
 0x334   :  { %v370_v21 = vsub.f32 %v362_v17, %v366_v15  ;;  %v359_v22 = vmul.f32 0.041666668, %v349_v18 }
 0x335   :  { %v355_v27 = vpop.xlane.xlu0 %354 }
 0x336   :  { %v374_v29 = vmax.f32 %v370_v21, 0.0  ;;  %v367_v30 = vsub.f32 %v359_v22, %v363_v19  ;;  %v361_v31 = vmul.f32 0.041666668, %v355_v27 }
 0x338   :  { %v378_v32 = vadd.f32 1e-05, %v374_v29  ;;  %v371_v33 = vmax.f32 %v367_v30, 0.0  ;;  %v369_v34 = vsub.f32 %v361_v31, %v365_v28  ;;  %v528_v31 = vld [vmem:[#allocation2 + $0x20] sm:$0xff] }
 0x339   :  { %v352_v36 = vpop.xlane.xlu0 %351  ;;  %1160 = vmatprep.mubr.msk.f32.mxu0 %vm548_vm8, %v528_v31 }
 0x33a   :  { %1231 = vrsqrt.f32 %v378_v32  ;;  %v375_v37 = vadd.f32 1e-05, %v371_v33  ;;  %v373_v38 = vmax.f32 %v369_v34, 0.0  ;;  %v360_v39 = vmul.f32 0.041666668, %v352_v36 }
 0x33b   :  { %v1310_v34 = vmov 3  }
 0x33c   :  { %1233 = vrsqrt.f32 %v375_v37  ;;  %v377_v40 = vadd.f32 1e-05, %v373_v38  ;;  %v368_v41 = vsub.f32 %v360_v39, %v364_v35 }
 0x33e   :  { %1235 = vrsqrt.f32 %v377_v40  ;;  %v372_v42 = vmax.f32 %v368_v41, 0.0 }
 0x340   :  { %v376_v43 = vadd.f32 1e-05, %v372_v42 }
 0x342   :  { %1237 = vrsqrt.f32 %v376_v43 }
 0x347   :  { %v1232_v44 = vpop.eup %1231 }
 0x348   :  { %v386_v45 = vmul.f32 %v1232_v44, %v1394_v20 }
 0x349   :  { %v1234_v46 = vpop.eup %1233 }
 0x34a   :  { %v390_v47 = vmul.f32 %v386_v45, %v342_v11  ;;  %v383_v48 = vmul.f32 %v1234_v46, %v1406_v24 }
 0x34b   :  { %v1236_v49 = vpop.eup %1235 }
 0x34c   :  { %401 = vrot.lane.b32.xlu0 %v390_v47, %s1308_s11  ;;  %v385_v50 = vmul.f32 %v1236_v49, %v1401_v23  ;;  %v387_v52 = vmul.f32 %v383_v48, %v339_v13 }
 0x34e   :  { %v389_v53 = vmul.f32 %v385_v50, %v341_v16 }
 0x34f   :  { %v1238_v54 = vpop.eup %1237 }
 0x350   :  { %395 = vrot.lane.b32.xlu0 %v387_v52, %s1308_s11  ;;  %399 = vrot.lane.b32.xlu1 %v389_v53, %s1308_s11  ;;  %v384_v55 = vmul.f32 %v1238_v54, %v1413_v25 }
 0x352   :  { %v388_v57 = vmul.f32 %v384_v55, %v340_v26 }
 0x354   :  { %423 = vperm.xlu0 %1216, %v385_v50   ;;  %397 = vrot.lane.b32.xlu1 %v388_v57, %s1308_s11  ;;  %v529_v57 = vld [vmem:[#allocation2 + $0x28] sm:$0xff] }
 0x358   :  { %428 = vperm.xlu1 %1215, %v386_v45   ;;  %1218 = vset.pattern.permute.xlu0 %v1309_v60 }
 0x35c   :  { %418 = vperm.xlu1 %1215, %v384_v55  }
 0x360   :  { %413 = vperm.xlu1 %1215, %v383_v48  }
 0x364   :  { %1217 = vset.pattern.permute.xlu1 %v1309_v60  ;;  %v530_v60 = vld [vmem:[#allocation2 + $0x30] sm:$0xff] }
 0x3be   :  { %v402_v61 = vpop.permute.xlu0 %401 }
 0x3bf   :  { %v410_v62 = vsub.f32 %v1394_v20, %v402_v61  ;;  %v531_v61 = vld [vmem:[#allocation2 + $0x38] sm:$0xff] }
 0x3c1   :  { %452 = vperm.xlu1 %1217, %v410_v62  }
 0x3c2   :  { %v400_v63 = vpop.permute.xlu1 %399  ;;  %v396_v1 = vpop.permute.xlu0 %395 }
 0x3c3   :  { %v409_v0 = vsub.f32 %v1401_v23, %v400_v63  ;;  %v407_v3 = vsub.f32 %v1406_v24, %v396_v1 }
 0x3c5   :  { %447 = vperm.xlu0 %1218, %v409_v0  }
 0x3c6   :  { %v398_v2 = vpop.permute.xlu1 %397 }
 0x3c7   :  { %v408_v4 = vsub.f32 %v1413_v25, %v398_v2 }
 0x3c9   :  { %442 = vperm.xlu1 %1217, %v408_v4   ;;  %437 = vperm.xlu0 %1218, %v407_v3  }
 0x3cd   :  { %1219 = vset.pattern.permute.xlu1 %v1310_v34  ;;  %1220 = vset.pattern.permute.xlu0 %v1310_v34 }
 0x3cf   :  { %v424_v9 = vpop.permute.xlu0 %423 }
 0x3d0   :  { %v433_v12 = vmul.f32 %v424_v9, %v1443_v59 }
 0x3d3   :  { %v429_v5 = vpop.permute.xlu1 %428 }
 0x3d4   :  { %v434_v8 = vmul.f32 %v429_v5, %v1439_v56 }
 0x3d7   :  { %v419_v6 = vpop.permute.xlu1 %418 }
 0x3d8   :  { %v432_v16 = vmul.f32 %v419_v6, %v1435_v51 }
 0x3db   :  { %v414_v7 = vpop.permute.xlu1 %413 }
 0x3dc   :  { %v431_v17 = vmul.f32 %v414_v7, %v1441_v58 }
 0x43c   :  { %v453_v10 = vpop.permute.xlu1 %452 }
 0x43d   :  { %v458_v11 = vadd.f32 %v453_v10, %v434_v8 }
 0x43f   :  { %v1477_v13 = vmax.f32 %v458_v11, 0.0 }
 0x440   :  { %v448_v14 = vpop.permute.xlu0 %447 }
 0x441   :  { %v457_v15 = vadd.f32 %v448_v14, %v433_v12  ;;  %485 = vrot.lane.b32.xlu1 %v1477_v13, %s1304_s1 }
 0x443   :  { %v1483_v18 = vmax.f32 %v457_v15, 0.0 }
 0x444   :  { %v443_v19 = vpop.permute.xlu1 %442  ;;  %v438_v56 = vpop.permute.xlu0 %437 }
 0x445   :  { %v456_v21 = vadd.f32 %v443_v19, %v432_v16  ;;  %v455_v22 = vadd.f32 %v438_v56, %v431_v17  ;;  %483 = vrot.lane.b32.xlu0 %v1483_v18, %s1304_s1 }
 0x447   :  { %v1487_v59 = vmax.f32 %v456_v21, 0.0  ;;  %v1489_v26 = vmax.f32 %v455_v22, 0.0  ;;  %v1311_v22 = vmov 4  }
 0x449   :  { %481 = vrot.lane.b32.xlu1 %v1487_v59, %s1304_s1  ;;  %479 = vrot.lane.b32.xlu0 %v1489_v26, %s1304_s1 }
 0x44d   :  { %473 = vrot.lane.b32.xlu1 %v1477_v13, %s1305_s28  ;;  %471 = vrot.lane.b32.xlu0 %v1483_v18, %s1305_s28 }
 0x451   :  { %469 = vrot.lane.b32.xlu1 %v1487_v59, %s1305_s28  ;;  %467 = vrot.lane.b32.xlu0 %v1489_v26, %s1305_s28 }
 0x4b3   :  { %v486_v51 = vpop.permute.xlu1 %485 }
 0x4b4   :  { %505 = vrot.lane.b32.xlu1 %v486_v51, %s1304_s1  ;;  %v519_v52 = vsel %vm515_vm9, %v1477_v13, %v486_v51 }
 0x4b7   :  { %v484_v58 = vpop.permute.xlu0 %483 }
 0x4b8   :  { %503 = vrot.lane.b32.xlu0 %v484_v58, %s1304_s1  ;;  %v518_v53 = vsel %vm515_vm9, %v1483_v18, %v484_v58 }
 0x4bb   :  { %v482_v27 = vpop.permute.xlu1 %481  ;;  %v1505_v28 = vpop.permute.xlu0 %479 }
 0x4bc   :  { %501 = vrot.lane.b32.xlu1 %v482_v27, %s1304_s1  ;;  %499 = vrot.lane.b32.xlu0 %v1505_v28, %s1304_s1  ;;  %v517_v54 = vsel %vm515_vm9, %v1487_v59, %v482_v27  ;;  %v516_v55 = vsel %vm515_vm9, %v1489_v26, %v1505_v28 }
 0x4bf   :  { %v474_v29 = vpop.permute.xlu1 %473  ;;  %v472_v30 = vpop.permute.xlu0 %471 }
 0x4c0   :  { %497 = vrot.lane.b32.xlu1 %v474_v29, %s1304_s1  ;;  %495 = vrot.lane.b32.xlu0 %v472_v30, %s1304_s1 }
 0x4c3   :  { %v470_v32 = vpop.permute.xlu1 %469  ;;  %v468_v33 = vpop.permute.xlu0 %467 }
 0x4c4   :  { %493 = vrot.lane.b32.xlu1 %v470_v32, %s1304_s1  ;;  %491 = vrot.lane.b32.xlu0 %v468_v33, %s1304_s1 }
 0x4c8   :  { %545 = vperm.xlu1 %1219, %v1394_v20   ;;  %541 = vperm.xlu0 %1220, %v1401_v23  }
 0x4cc   :  { %537 = vperm.xlu1 %1219, %v1413_v25   ;;  %1221 = vset.pattern.permute.xlu0 %v1311_v22 }
 0x4d0   :  { %533 = vperm.xlu1 %1219, %v1406_v24  }
 0x4d4   :  { %1222 = vset.pattern.permute.xlu1 %v1311_v22 }
 0x526   :  { %v506_v35 = vpop.permute.xlu1 %505 }
 0x527   :  { %v527_v36 = vsel %vm515_vm9, %v486_v51, %v506_v35 }
 0x528   :  { %1136 = vmatprep.subr.mxu0 %v527_v36 }
 0x529   :  { %1137 = vmatpush3.msra.mxu0 %v527_v36 }
 0x52a   :  { %v504_v37 = vpop.permute.xlu0 %503 }
 0x52b   :  { %v526_v38 = vsel %vm515_vm9, %v484_v58, %v504_v37 }
 0x52c   :  { %1138 = vmatprep.subr.mxu0 %v526_v38 }
 0x52d   :  { %1139 = vmatpush3.msra.mxu0 %v526_v38 }
 0x52e   :  { %v502_v39 = vpop.permute.xlu1 %501  ;;  %v500_v40 = vpop.permute.xlu0 %499 }
 0x52f   :  { %v525_v41 = vsel %vm515_vm9, %v482_v27, %v502_v39  ;;  %v524_v42 = vsel %vm515_vm9, %v1505_v28, %v500_v40 }
 0x530   :  { %1140 = vmatprep.subr.mxu0 %v525_v41 }
 0x531   :  { %1141 = vmatpush3.msra.mxu0 %v525_v41 }
 0x532   :  { %v498_v43 = vpop.permute.xlu1 %497  ;;  %1142 = vmatprep.subr.mxu0 %v524_v42  ;;  %v496_v44 = vpop.permute.xlu0 %495 }
 0x533   :  { %1143 = vmatpush3.msra.mxu0 %v524_v42  ;;  %v523_v45 = vsel %vm515_vm9, %v474_v29, %v498_v43  ;;  %v522_v46 = vsel %vm515_vm9, %v472_v30, %v496_v44 }
 0x534   :  { %1144 = vmatprep.subr.mxu0 %v523_v45 }
 0x535   :  { %1145 = vmatpush3.msra.mxu0 %v523_v45 }
 0x536   :  { %v494_v47 = vpop.permute.xlu1 %493  ;;  %1146 = vmatprep.subr.mxu0 %v522_v46  ;;  %v492_v48 = vpop.permute.xlu0 %491 }
 0x537   :  { %1147 = vmatpush3.msra.mxu0 %v522_v46  ;;  %v521_v49 = vsel %vm515_vm9, %v470_v32, %v494_v47  ;;  %v520_v50 = vsel %vm515_vm9, %v468_v33, %v492_v48 }
 0x538   :  { %1148 = vmatprep.subr.mxu0 %v521_v49 }
 0x539   :  { %1149 = vmatpush3.msra.mxu0 %v521_v49 }
 0x53a   :  { %1150 = vmatprep.subr.mxu0 %v520_v50 }
 0x53b   :  { %1151 = vmatpush3.msra.mxu0 %v520_v50 }
 0x53c   :  { %1152 = vmatprep.subr.mxu0 %v519_v52 }
 0x53d   :  { %1153 = vmatpush3.msra.mxu0 %v519_v52 }
 0x53e   :  { %1154 = vmatprep.subr.mxu0 %v518_v53 }
 0x53f   :  { %1155 = vmatpush3.msra.mxu0 %v518_v53 }
 0x540   :  { %1156 = vmatprep.subr.mxu0 %v517_v54 }
 0x541   :  { %1157 = vmatpush3.msra.mxu0 %v517_v54 }
 0x542   :  { %1158 = vmatprep.subr.mxu0 %v516_v55 }
 0x543   :  { %1159 = vmatpush3.msra.mxu0 %v516_v55  ;;  %v546_v62 = vpop.permute.xlu1 %545  ;;  %v542_v5 = vpop.permute.xlu0 %541 }
 0x544   :  { %1161 = vmatmul.mubr.msk.f32.vlgmr.msra.gmra.mxu0 %vm548_vm8, %v529_v57 }
 0x545   :  { %1163 = vmatprep.mubr.msk.f32.mxu0 %vm548_vm8, %v530_v60 }
 0x547   :  { %v538_v63 = vpop.permute.xlu1 %537 }
 0x548   :  { %1164 = vmatmul.mubr.msk.f32.gmra.mxu0 %vm548_vm8, %v531_v61 }
 0x54b   :  { %v534_v13 = vpop.permute.xlu1 %533 }
 0x604   :  { %v1162_v0 = vpop.f32.mrf.mxu0 }
 0x605   :  { %v1540_v1 = vadd.f32 %v1162_v0, %v538_v63 }
 0x606   :  { %v627_v2 = vpop.f32.mrf.mxu0 }
 0x607   :  { %v650_v3 = vsel %vm646_vm10, %v1540_v1, 0.0  ;;  %v1556_v14 = vadd.f32 %v627_v2, %v534_v13  ;;  %v665_v17 = vmul.f32 %v1540_v1, %v1540_v1 }
 0x608   :  { %651 = vadd.xlane.f32.xlu0 %v650_v3  ;;  %v1165_v4 = vpop.f32.mrf.mxu0 }
 0x609   :  { %v1544_v6 = vadd.f32 %v1165_v4, %v546_v62  ;;  %v647_v18 = vsel %vm646_vm10, %v1556_v14, 0.0  ;;  %v664_v19 = vmul.f32 %v1556_v14, %v1556_v14  ;;  %v671_v56 = vsel %vm646_vm10, %v665_v17, 0.0 }
 0x60a   :  { %v637_v7 = vpop.f32.mrf.mxu0 }
 0x60b   :  { %v1546_v8 = vadd.f32 %v637_v7, %v542_v5  ;;  %v656_v9 = vsel %vm646_vm10, %v1544_v6, 0.0  ;;  %v667_v10 = vmul.f32 %v1544_v6, %v1544_v6  ;;  %v668_v21 = vsel %vm646_vm10, %v664_v19, 0.0 }
 0x60c   :  { %657 = vadd.xlane.f32.xlu0 %v656_v9 }
 0x60d   :  { %v653_v11 = vsel %vm646_vm10, %v1546_v8, 0.0  ;;  %v666_v12 = vmul.f32 %v1546_v8, %v1546_v8  ;;  %v677_v15 = vsel %vm646_vm10, %v667_v10, 0.0  ;;  %v1312_v10 = vmov 5  }
 0x60e   :  { %654 = vadd.xlane.f32.xlu1 %v653_v11 }
 0x60f   :  { %v674_v16 = vsel %vm646_vm10, %v666_v12, 0.0 }
 0x610   :  { %678 = vadd.xlane.f32.xlu0 %v677_v15 }
 0x612   :  { %675 = vadd.xlane.f32.xlu1 %v674_v16 }
 0x614   :  { %648 = vadd.xlane.f32.xlu0 %v647_v18 }
 0x616   :  { %672 = vadd.xlane.f32.xlu1 %v671_v56 }
 0x618   :  { %669 = vadd.xlane.f32.xlu0 %v668_v21 }
 0x691   :  { %v652_v59 = vpop.xlane.xlu0 %651 }
 0x692   :  { %v661_v32 = vmul.f32 0.05, %v652_v59 }
 0x694   :  { %v685_v41 = vmul.f32 %v661_v32, %v661_v32 }
 0x695   :  { %v658_v26 = vpop.xlane.xlu0 %657 }
 0x696   :  { %v663_v51 = vmul.f32 0.05, %v658_v26 }
 0x697   :  { %v655_v58 = vpop.xlane.xlu1 %654 }
 0x698   :  { %v662_v27 = vmul.f32 0.05, %v655_v58  ;;  %v687_v29 = vmul.f32 %v663_v51, %v663_v51 }
 0x699   :  { %v679_v28 = vpop.xlane.xlu0 %678 }
 0x69a   :  { %v683_v30 = vmul.f32 0.05, %v679_v28  ;;  %v686_v33 = vmul.f32 %v662_v27, %v662_v27 }
 0x69b   :  { %v676_v31 = vpop.xlane.xlu1 %675 }
 0x69c   :  { %v691_v34 = vsub.f32 %v683_v30, %v687_v29  ;;  %v682_v35 = vmul.f32 0.05, %v676_v31 }
 0x69d   :  { %v649_v36 = vpop.xlane.xlu0 %648 }
 0x69e   :  { %v695_v37 = vmax.f32 %v691_v34, 0.0  ;;  %v690_v38 = vsub.f32 %v682_v35, %v686_v33  ;;  %v660_v39 = vmul.f32 0.05, %v649_v36 }
 0x69f   :  { %v673_v40 = vpop.xlane.xlu1 %672 }
 0x6a0   :  { %v699_v42 = vadd.f32 1e-05, %v695_v37  ;;  %v694_v43 = vmax.f32 %v690_v38, 0.0  ;;  %v681_v44 = vmul.f32 0.05, %v673_v40  ;;  %v684_v45 = vmul.f32 %v660_v39, %v660_v39  ;;  %v849_v40 = vld [vmem:[#allocation2 + $0x40] sm:$0xff] }
 0x6a1   :  { %v670_v46 = vpop.xlane.xlu0 %669  ;;  %1190 = vmatprep.mubr.msk.f32.mxu1 %vm548_vm8, %v849_v40  ;;  %v1251_v40 = vld [vmem:[%s1661_s3] sm:$0xff] }
 0x6a2   :  { %1239 = vrsqrt.f32 %v699_v42  ;;  %v698_v47 = vadd.f32 1e-05, %v694_v43  ;;  %v689_v48 = vsub.f32 %v681_v44, %v685_v41  ;;  %v680_v49 = vmul.f32 0.05, %v670_v46 }
 0x6a3   :  { %v1313_v43 = vmov 6  }
 0x6a4   :  { %1241 = vrsqrt.f32 %v698_v47  ;;  %v693_v50 = vmax.f32 %v689_v48, 0.0  ;;  %v688_v52 = vsub.f32 %v680_v49, %v684_v45 }
 0x6a6   :  { %v697_v53 = vadd.f32 1e-05, %v693_v50  ;;  %v692_v54 = vmax.f32 %v688_v52, 0.0 }
 0x6a8   :  { %1243 = vrsqrt.f32 %v697_v53  ;;  %v696_v55 = vadd.f32 1e-05, %v692_v54 }
 0x6aa   :  { %1245 = vrsqrt.f32 %v696_v55 }
 0x6af   :  { %v1240_v57 = vpop.eup %1239 }
 0x6b0   :  { %v707_v60 = vmul.f32 %v1240_v57, %v1394_v20 }
 0x6b1   :  { %v1242_v61 = vpop.eup %1241 }
 0x6b2   :  { %v711_v62 = vmul.f32 %v707_v60, %v663_v51  ;;  %v706_v63 = vmul.f32 %v1242_v61, %v1401_v23 }
 0x6b4   :  { %722 = vrot.lane.b32.xlu1 %v711_v62, %s1308_s11  ;;  %v710_v0 = vmul.f32 %v706_v63, %v662_v27 }
 0x6b5   :  { %v1244_v2 = vpop.eup %1243 }
 0x6b6   :  { %720 = vrot.lane.b32.xlu0 %v710_v0, %s1308_s11  ;;  %v705_v3 = vmul.f32 %v1244_v2, %v1413_v25 }
 0x6b7   :  { %v1246_v4 = vpop.eup %1245 }
 0x6b8   :  { %v709_v5 = vmul.f32 %v705_v3, %v661_v32  ;;  %v704_v7 = vmul.f32 %v1246_v4, %v1406_v24 }
 0x6ba   :  { %749 = vperm.xlu0 %1221, %v707_v60   ;;  %718 = vrot.lane.b32.xlu1 %v709_v5, %s1308_s11  ;;  %v708_v9 = vmul.f32 %v704_v7, %v660_v39  ;;  %v850_v5 = vld [vmem:[#allocation2 + $0x48] sm:$0xff] }
 0x6be   :  { %739 = vperm.xlu0 %1221, %v705_v3   ;;  %716 = vrot.lane.b32.xlu1 %v708_v9, %s1308_s11 }
 0x6c2   :  { %734 = vperm.xlu0 %1221, %v704_v7   ;;  %744 = vperm.xlu1 %1222, %v706_v63  }
 0x6c6   :  { %1223 = vset.pattern.permute.xlu1 %v1312_v10  ;;  %1224 = vset.pattern.permute.xlu0 %v1312_v10 }
 0x726   :  { %v723_v11 = vpop.permute.xlu1 %722 }
 0x727   :  { %v731_v12 = vsub.f32 %v1394_v20, %v723_v11 }
 0x728   :  { %v721_v13 = vpop.permute.xlu0 %720 }
 0x729   :  { %773 = vperm.xlu1 %1223, %v731_v12   ;;  %v730_v15 = vsub.f32 %v1401_v23, %v721_v13 }
 0x72c   :  { %v719_v16 = vpop.permute.xlu1 %718 }
 0x72d   :  { %768 = vperm.xlu1 %1223, %v730_v15   ;;  %v729_v17 = vsub.f32 %v1413_v25, %v719_v16 }
 0x730   :  { %v717_v18 = vpop.permute.xlu1 %716 }
 0x731   :  { %v728_v19 = vsub.f32 %v1406_v24, %v717_v18  ;;  %763 = vperm.xlu1 %1223, %v729_v17  }
 0x733   :  { %758 = vperm.xlu0 %1224, %v728_v19  }
 0x735   :  { %v750_v56 = vpop.permute.xlu0 %749  ;;  %1226 = vset.pattern.permute.xlu1 %v1313_v43 }
 0x736   :  { %v755_v22 = vmul.f32 %v750_v56, %v1544_v6 }
 0x737   :  { %1225 = vset.pattern.permute.xlu0 %v1313_v43 }
 0x739   :  { %v740_v59 = vpop.permute.xlu0 %739 }
 0x73a   :  { %v753_v29 = vmul.f32 %v740_v59, %v1540_v1 }
 0x73d   :  { %v745_v21 = vpop.permute.xlu1 %744  ;;  %v735_v28 = vpop.permute.xlu0 %734 }
 0x73e   :  { %v754_v51 = vmul.f32 %v745_v21, %v1546_v8  ;;  %v752_v6 = vmul.f32 %v735_v28, %v1556_v14  ;;  %v1314_v21 = vmov 7  }
 0x7a4   :  { %v774_v26 = vpop.permute.xlu1 %773 }
 0x7a5   :  { %v779_v20 = vadd.f32 %v774_v26, %v755_v22 }
 0x7a7   :  { %v1582_v58 = vmax.f32 %v779_v20, 0.0 }
 0x7a8   :  { %v769_v23 = vpop.permute.xlu1 %768 }
 0x7a9   :  { %v778_v27 = vadd.f32 %v769_v23, %v754_v51  ;;  %806 = vrot.lane.b32.xlu1 %v1582_v58, %s1304_s1 }
 0x7ab   :  { %v1587_v30 = vmax.f32 %v778_v27, 0.0 }
 0x7ac   :  { %v764_v31 = vpop.permute.xlu1 %763 }
 0x7ad   :  { %v777_v32 = vadd.f32 %v764_v31, %v753_v29  ;;  %804 = vrot.lane.b32.xlu1 %v1587_v30, %s1304_s1 }
 0x7ae   :  { %v759_v8 = vpop.permute.xlu0 %758 }
 0x7af   :  { %v1592_v33 = vmax.f32 %v777_v32, 0.0  ;;  %v776_v34 = vadd.f32 %v759_v8, %v752_v6 }
 0x7b1   :  { %v1594_v35 = vmax.f32 %v776_v34, 0.0  ;;  %802 = vrot.lane.b32.xlu0 %v1592_v33, %s1304_s1 }
 0x7b3   :  { %800 = vrot.lane.b32.xlu1 %v1594_v35, %s1304_s1 }
 0x7b5   :  { %794 = vrot.lane.b32.xlu0 %v1582_v58, %s1305_s28 }
 0x7b7   :  { %792 = vrot.lane.b32.xlu1 %v1587_v30, %s1305_s28 }
 0x7b9   :  { %790 = vrot.lane.b32.xlu0 %v1592_v33, %s1305_s28 }
 0x7bb   :  { %788 = vrot.lane.b32.xlu1 %v1594_v35, %s1305_s28 }
 0x81b   :  { %v807_v1 = vpop.permute.xlu1 %806 }
 0x81c   :  { %826 = vrot.lane.b32.xlu0 %v807_v1, %s1304_s1  ;;  %v840_v0 = vsel %vm836_vm11, %v1582_v58, %v807_v1 }
 0x81f   :  { %v805_v14 = vpop.permute.xlu1 %804 }
 0x820   :  { %824 = vrot.lane.b32.xlu1 %v805_v14, %s1304_s1  ;;  %v839_v2 = vsel %vm836_vm11, %v1587_v30, %v805_v14 }
 0x823   :  { %v803_v36 = vpop.permute.xlu0 %802 }
 0x824   :  { %822 = vrot.lane.b32.xlu0 %v803_v36, %s1304_s1  ;;  %v838_v3 = vsel %vm836_vm11, %v1592_v33, %v803_v36 }
 0x825   :  { %v801_v37 = vpop.permute.xlu1 %800 }
 0x826   :  { %820 = vrot.lane.b32.xlu1 %v801_v37, %s1304_s1  ;;  %v837_v4 = vsel %vm836_vm11, %v1594_v35, %v801_v37 }
 0x827   :  { %v795_v38 = vpop.permute.xlu0 %794 }
 0x828   :  { %818 = vrot.lane.b32.xlu0 %v795_v38, %s1304_s1 }
 0x829   :  { %v793_v39 = vpop.permute.xlu1 %792 }
 0x82a   :  { %816 = vrot.lane.b32.xlu1 %v793_v39, %s1304_s1 }
 0x82b   :  { %v791_v41 = vpop.permute.xlu0 %790 }
 0x82c   :  { %814 = vrot.lane.b32.xlu0 %v791_v41, %s1304_s1 }
 0x82d   :  { %v789_v42 = vpop.permute.xlu1 %788 }
 0x82e   :  { %812 = vrot.lane.b32.xlu1 %v789_v42, %s1304_s1 }
 0x830   :  { %855 = vperm.xlu0 %1225, %v1406_v24  }
 0x832   :  { %860 = vperm.xlu1 %1226, %v1413_v25  }
 0x834   :  { %1228 = vset.pattern.permute.xlu0 %v1314_v21 }
 0x836   :  { %1227 = vset.pattern.permute.xlu1 %v1314_v21 }
 0x88e   :  { %v827_v44 = vpop.permute.xlu0 %826 }
 0x88f   :  { %v848_v45 = vsel %vm836_vm11, %v807_v1, %v827_v44 }
 0x890   :  { %1166 = vmatprep.subr.mxu1 %v848_v45 }
 0x891   :  { %1167 = vmatpush3.msra.mxu1 %v848_v45 }
 0x892   :  { %v825_v46 = vpop.permute.xlu1 %824 }
 0x893   :  { %v847_v47 = vsel %vm836_vm11, %v805_v14, %v825_v46 }
 0x894   :  { %1168 = vmatprep.subr.mxu1 %v847_v47 }
 0x895   :  { %1169 = vmatpush3.msra.mxu1 %v847_v47 }
 0x896   :  { %v823_v48 = vpop.permute.xlu0 %822 }
 0x897   :  { %v846_v49 = vsel %vm836_vm11, %v803_v36, %v823_v48 }
 0x898   :  { %v821_v50 = vpop.permute.xlu1 %820  ;;  %1170 = vmatprep.subr.mxu1 %v846_v49 }
 0x899   :  { %1171 = vmatpush3.msra.mxu1 %v846_v49  ;;  %v845_v52 = vsel %vm836_vm11, %v801_v37, %v821_v50 }
 0x89a   :  { %1172 = vmatprep.subr.mxu1 %v845_v52  ;;  %v819_v53 = vpop.permute.xlu0 %818 }
 0x89b   :  { %1173 = vmatpush3.msra.mxu1 %v845_v52  ;;  %v844_v54 = vsel %vm836_vm11, %v795_v38, %v819_v53  ;;  %v1315_v38 = vmov 8  }
 0x89c   :  { %v817_v55 = vpop.permute.xlu1 %816  ;;  %1174 = vmatprep.subr.mxu1 %v844_v54 }
 0x89d   :  { %1175 = vmatpush3.msra.mxu1 %v844_v54  ;;  %v843_v57 = vsel %vm836_vm11, %v793_v39, %v817_v55 }
 0x89e   :  { %1176 = vmatprep.subr.mxu1 %v843_v57  ;;  %v815_v60 = vpop.permute.xlu0 %814 }
 0x89f   :  { %1177 = vmatpush3.msra.mxu1 %v843_v57  ;;  %v842_v61 = vsel %vm836_vm11, %v791_v41, %v815_v60 }
 0x8a0   :  { %v813_v62 = vpop.permute.xlu1 %812  ;;  %1178 = vmatprep.subr.mxu1 %v842_v61 }
 0x8a1   :  { %1179 = vmatpush3.msra.mxu1 %v842_v61  ;;  %v841_v63 = vsel %vm836_vm11, %v789_v42, %v813_v62 }
 0x8a2   :  { %1180 = vmatprep.subr.mxu1 %v841_v63 }
 0x8a3   :  { %1181 = vmatpush3.msra.mxu1 %v841_v63 }
 0x8a4   :  { %1182 = vmatprep.subr.mxu1 %v840_v0 }
 0x8a5   :  { %1183 = vmatpush3.msra.mxu1 %v840_v0 }
 0x8a6   :  { %1184 = vmatprep.subr.mxu1 %v839_v2 }
 0x8a7   :  { %1185 = vmatpush3.msra.mxu1 %v839_v2 }
 0x8a8   :  { %1186 = vmatprep.subr.mxu1 %v838_v3 }
 0x8a9   :  { %1187 = vmatpush3.msra.mxu1 %v838_v3 }
 0x8aa   :  { %1188 = vmatprep.subr.mxu1 %v837_v4 }
 0x8ab   :  { %1189 = vmatpush3.msra.mxu1 %v837_v4  ;;  %v856_v10 = vpop.permute.xlu0 %855 }
 0x8ac   :  { %1191 = vmatmul.mubr.msk.f32.vlgmr.msra.gmra.mxu1 %vm548_vm8, %v850_v5 }
 0x8ad   :  { %v861_v7 = vpop.permute.xlu1 %860 }
 0x96c   :  { %v1192_v9 = vpop.f32.mrf.mxu1 }
 0x96d   :  { %v941_v11 = vadd.f32 %v1192_v9, %v861_v7 }
 0x96e   :  { %v935_v12 = vpop.f32.mrf.mxu1 }
 0x96f   :  { %v936_v13 = vadd.f32 %v935_v12, %v856_v10  ;;  %v948_v15 = vsel %vm944_vm12, %v941_v11, 0.0  ;;  %v955_v18 = vmul.f32 %v941_v11, %v941_v11 }
 0x970   :  { %949 = vadd.xlane.f32.xlu0 %v948_v15 }
 0x971   :  { %v945_v16 = vsel %vm944_vm12, %v936_v13, 0.0  ;;  %v954_v17 = vmul.f32 %v936_v13, %v936_v13  ;;  %v959_v56 = vsel %vm944_vm12, %v955_v18, 0.0 }
 0x972   :  { %946 = vadd.xlane.f32.xlu1 %v945_v16 }
 0x973   :  { %v956_v19 = vsel %vm944_vm12, %v954_v17, 0.0 }
 0x974   :  { %957 = vadd.xlane.f32.xlu0 %v956_v19 }
 0x976   :  { %960 = vadd.xlane.f32.xlu1 %v959_v56 }
 0x9f9   :  { %v950_v22 = vpop.xlane.xlu0 %949 }
 0x9fa   :  { %v953_v26 = vmul.f32 0.0625, %v950_v22 }
 0x9fb   :  { %v947_v59 = vpop.xlane.xlu1 %946 }
 0x9fc   :  { %v952_v20 = vmul.f32 0.0625, %v947_v59  ;;  %v965_v28 = vmul.f32 %v953_v26, %v953_v26 }
 0x9fd   :  { %v958_v51 = vpop.xlane.xlu0 %957 }
 0x9fe   :  { %v964_v58 = vmul.f32 %v952_v20, %v952_v20  ;;  %v962_v23 = vmul.f32 0.0625, %v958_v51 }
 0x9ff   :  { %v961_v27 = vpop.xlane.xlu1 %960 }
 0xa00   :  { %v966_v29 = vsub.f32 %v962_v23, %v964_v58  ;;  %v963_v30 = vmul.f32 0.0625, %v961_v27 }
 0xa02   :  { %v968_v31 = vmax.f32 %v966_v29, 0.0  ;;  %v967_v6 = vsub.f32 %v963_v30, %v965_v28 }
 0xa04   :  { %v970_v32 = vadd.f32 1e-05, %v968_v31  ;;  %v969_v8 = vmax.f32 %v967_v6, 0.0 }
 0xa06   :  { %1247 = vrsqrt.f32 %v970_v32  ;;  %v971_v33 = vadd.f32 1e-05, %v969_v8 }
 0xa08   :  { %1249 = vrsqrt.f32 %v971_v33 }
 0xa13   :  { %v1248_v34 = vpop.eup %1247 }
 0xa14   :  { %v974_v35 = vmul.f32 %v1248_v34, %v1406_v24 }
 0xa15   :  { %v1250_v1 = vpop.eup %1249 }
 0xa16   :  { %v976_v14 = vmul.f32 %v974_v35, %v952_v20  ;;  %v975_v36 = vmul.f32 %v1250_v1, %v1413_v25  ;;  %v1252_v25 = vld [vmem:[%s1661_s3 + $0x8] sm:$0xff]  ;;  %s1273_s3 = scalar_lea.vmem %s1022_s17, 256 }
 0xa17   :  { %p1274_p5 = scmp.ne.s32.totalorder %s1022_s17, %s1273_s3  ;;  %p1279_p7 = scmp.lt.s32.totalorder %s1273_s3, %s1273_s3 }
 0xa18   :  { %980 = vrot.lane.b32.xlu0 %v976_v14, %s1308_s11  ;;  %v977_v37 = vmul.f32 %v975_v36, %v953_v26 }
 0xa19   :  { %p1280_p8 = por %p1279_p7, %p1278_p6 }
 0xa1a   :  { %982 = vrot.lane.b32.xlu1 %v977_v37, %s1308_s11 }
 0xa1b   :  { %p1281_p9 = pnand %p1280_p8, %p1274_p5 }
 0xa1c   :  { %995 = vperm.xlu0 %1228, %v975_v36  }
 0xa1e   :  { %990 = vperm.xlu1 %1227, %v974_v35  }
 0xa20   :  { %1230 = vset.pattern.permute.xlu0 %v1315_v38 }
 0xa22   :  { %1229 = vset.pattern.permute.xlu1 %v1315_v38 }
 0xa8a   :  { %v981_v39 = vpop.permute.xlu0 %980 }
 0xa8b   :  { %v986_v24 = vsub.f32 %v1251_v40, %v981_v39 }
 0xa8c   :  { %v983_v41 = vpop.permute.xlu1 %982 }
 0xa8d   :  { %1002 = vperm.xlu1 %1229, %v986_v24   ;;  %v987_v42 = vsub.f32 %v1252_v25, %v983_v41 }
 0xa91   :  { %1007 = vperm.xlu1 %1229, %v987_v42  }
 0xa97   :  { %v996_v45 = vpop.permute.xlu0 %995 }
 0xa98   :  { %v999_v48 = vmul.f32 %v996_v45, %v941_v11 }
 0xa99   :  { %v991_v43 = vpop.permute.xlu1 %990 }
 0xa9a   :  { %v998_v44 = vmul.f32 %v991_v43, %v936_v13 }
 0xb08   :  { %v1003_v46 = vpop.permute.xlu1 %1002 }
 0xb09   :  { %v1010_v47 = vadd.f32 %v1003_v46, %v998_v44 }
 0xb0b   :  { %v1012_v49 = vmax.f32 %v1010_v47, 0.0 }
 0xb0c   :  { %v1008_v50 = vpop.permute.xlu1 %1007 }
 0xb0d   :  { %1014 = vst.msk [vmem:[#allocation5] sm:$0xff] %vm944_vm12, %v1012_v49  ;;  %v1011_v52 = vadd.f32 %v1008_v50, %v999_v48 }
 0xb0f   :  { %v1013_v53 = vmax.f32 %v1011_v52, 0.0 }
 0xb11   :  { %1015 = vst.msk [vmem:[#allocation5 + $0x8] sm:$0xff] %vm944_vm12, %v1013_v53 }
 0xb12   :  { %1284 = shalt.err (!%p1281_p9)
}
 0xb13   :  { %1027 = dma.vmem_to_hbm [thread:$0]  %s1022_s17, 256, %s1662_s4, [#allocation4], %s1298_s18, %s1298_s18, %s1299_s19  }
 0xb14   :  { %1295 = dma.done.wait [#allocation4], 256  }
 0xb15   :  { %1296 = vsyncadd [#allocation4], 4294967040 }
 0xb16   :  { %1031 = vsyncpa [#allocation3], 1 }
 0xb17   :  { %1032 = vsyncpa [#allocation4], 1 }

</bundles_post_ra>
